<compile_context>
chip_gen: v6e
topology: v6e:2x2x1
jax: 0.10.0
libtpu: 0.0.40
codegen_flags: <defaults>
</compile_context>

<pallas_src>
import functools

import jax
import jax.numpy as jnp
from jax.experimental import pallas as pl
from jax.experimental.pallas import tpu as pltpu


def _round_up(x, m):
    return ((x + m - 1) // m) * m


# -----------------------------------------------------------------------------
# Pallas kernel: fused complex im2col-matmul producing one output slab
#   out[:, :C_out]        = P_r @ W_r - P_i @ W_i + (b_r - b_i)
#   out[:, C_out:2*C_out] = P_r @ W_i + P_i @ W_r + (b_r + b_i)
# via out = P_r @ [W_r | W_i] + P_i @ [-W_i | W_r] + [b_r-b_i | b_r+b_i]
# -----------------------------------------------------------------------------
def _complex_mm_kernel(pr_ref, pi_ref, wa_ref, wb_ref, b_ref, out_ref):
    acc = jnp.dot(pr_ref[...], wa_ref[...], preferred_element_type=jnp.float32)
    acc = acc + jnp.dot(pi_ref[...], wb_ref[...],
                        preferred_element_type=jnp.float32)
    out_ref[...] = (acc + b_ref[...]).astype(out_ref.dtype)


def _complex_matmul(pr, pi, wa, wb, b2, *, tm, vmem_limit_bytes):
    """pr/pi: (Mpad, Kp) bf16; wa/wb: (Kp, Wout) bf16; b2: (1, Wout) f32."""
    Mpad, Kp = pr.shape
    Wout = wa.shape[1]
    grid = (Mpad // tm,)
    return pl.pallas_call(
        _complex_mm_kernel,
        out_shape=jax.ShapeDtypeStruct((Mpad, Wout), jnp.float32),
        grid=grid,
        in_specs=[
            pl.BlockSpec((tm, Kp), lambda i: (i, 0)),     # P_r row tile
            pl.BlockSpec((tm, Kp), lambda i: (i, 0)),     # P_i row tile
            pl.BlockSpec((Kp, Wout), lambda i: (0, 0)),   # [W_r | W_i] (resident)
            pl.BlockSpec((Kp, Wout), lambda i: (0, 0)),   # [-W_i | W_r] (resident)
            pl.BlockSpec((1, Wout), lambda i: (0, 0)),    # packed bias
        ],
        out_specs=pl.BlockSpec((tm, Wout), lambda i: (i, 0)),
        compiler_params=pltpu.CompilerParams(
            dimension_semantics=("parallel",),
            vmem_limit_bytes=vmem_limit_bytes,
        ),
    )(pr, pi, wa, wb, b2)


# -----------------------------------------------------------------------------
# Generation-aware tile selection
# -----------------------------------------------------------------------------
def _vmem_capacity_bytes():
    try:
        return int(pltpu.get_tpu_info().vmem_capacity_bytes)
    except Exception:
        return 64 * 1024 * 1024  # conservative (v7x per-core) fallback


def _pick_tile(M, Kp, Wout, vmem_bytes):
    big_vmem = vmem_bytes >= 96 * 1024 * 1024       # v5e / v6e (128 MiB)
    tm_cap = 2048 if big_vmem else 1024             # v7x keeps smaller tiles
    budget = int(vmem_bytes * 0.70)

    if M >= 256:
        # >= 2 grid steps (keeps both v7x TensorCores busy), 128-aligned tm.
        tm = min(tm_cap, _round_up((M + 1) // 2, 128))
    else:
        tm = _round_up(max(M, 16), 16)

    def tile_bytes(t):
        return (2 * 2 * t * Kp * 2        # pr, pi blocks (bf16, double-buffered)
                + 2 * t * Wout * 4        # out block (f32, double-buffered)
                + 2 * 2 * Kp * Wout * 2   # weight slabs (bf16, double-buffered)
                + 2 * Wout * 4)           # bias

    while tm > 16 and tile_bytes(tm) > budget:
        tm //= 2
    tm = max(16, (tm // 16) * 16)         # bf16 sublane-packing friendly

    vmem_limit = min(int(vmem_bytes * 0.80), 100 * 1024 * 1024)
    return tm, vmem_limit


# -----------------------------------------------------------------------------
# Plain-JAX glue: im2col in NHWC order (K ordered (i, j, c), c fastest)
# -----------------------------------------------------------------------------
def _im2col_nhwc(x_nchw, kh, kw, stride, padding, dilation):
    """x: (N, C, H, W) -> patches (N*OH*OW, kh*kw*C)."""
    N, C, H, W = x_nchw.shape
    x = jnp.transpose(x_nchw, (0, 2, 3, 1))  # only the small input is moved
    if padding > 0:
        x = jnp.pad(x, ((0, 0), (padding, padding), (padding, padding), (0, 0)))
    Hp = H + 2 * padding
    Wp = W + 2 * padding
    OH = (Hp - dilation * (kh - 1) - 1) // stride + 1
    OW = (Wp - dilation * (kw - 1) - 1) // stride + 1

    cols = []
    for i in range(kh):
        for j in range(kw):
            r0 = i * dilation
            c0 = j * dilation
            sl = x[:, r0:r0 + (OH - 1) * stride + 1:stride,
                      c0:c0 + (OW - 1) * stride + 1:stride, :]  # (N, OH, OW, C)
            cols.append(sl)
    patches = jnp.concatenate(cols, axis=-1)          # (N, OH, OW, kh*kw*C)
    return patches.reshape(N * OH * OW, kh * kw * C), OH, OW


@functools.partial(
    jax.jit, static_argnames=("kh", "kw", "stride", "padding", "dilation"))
def _complex_conv2d_fwd(x_r, x_i, w_r, w_i, b_r, b_i, *, kh, kw, stride,
                        padding, dilation):
    N, C, _, _ = x_r.shape
    C_out = w_r.shape[0]
    K = C * kh * kw
    Kp = _round_up(K, 8)                  # sublane-aligned only, NOT 128-padded

    # im2col per part (no concatenated-input prologue pass).
    pr, OH, OW = _im2col_nhwc(x_r, kh, kw, stride, padding, dilation)
    pi, _, _ = _im2col_nhwc(x_i, kh, kw, stride, padding, dilation)
    M = N * OH * OW

    # Output slab: unpadded when small (cuts writeback 8x for tiny C_out),
    # 128-lane-dense only when 2*C_out is already >= 128.
    two_cout = 2 * C_out
    Wout = _round_up(two_cout, 128) if two_cout >= 128 else two_cout

    tm, vmem_limit = _pick_tile(M, Kp, Wout, _vmem_capacity_bytes())
    Mpad = _round_up(M, tm)

    # One fused XLA pass each: pad (M rows, K->Kp) + cast to bf16.
    pr = jnp.pad(pr, ((0, Mpad - M), (0, Kp - K))).astype(jnp.bfloat16)
    pi = jnp.pad(pi, ((0, Mpad - M), (0, Kp - K))).astype(jnp.bfloat16)

    # (C_out, C_in, kh, kw) -> (K, C_out), K ordered (i, j, c) to match im2col.
    wr = jnp.transpose(w_r, (2, 3, 1, 0)).reshape(K, C_out)
    wi = jnp.transpose(w_i, (2, 3, 1, 0)).reshape(K, C_out)
    wa = jnp.pad(jnp.concatenate([wr, wi], axis=1),
                 ((0, Kp - K), (0, Wout - two_cout))).astype(jnp.bfloat16)
    wb = jnp.pad(jnp.concatenate([-wi, wr], axis=1),
                 ((0, Kp - K), (0, Wout - two_cout))).astype(jnp.bfloat16)

    # Effective biases: real part gets (b_r - b_i), imag part gets (b_r + b_i).
    b2 = jnp.concatenate([b_r - b_i, b_r + b_i], axis=0)
    b2 = jnp.pad(b2, (0, Wout - two_cout)).reshape(1, Wout).astype(jnp.float32)

    out2 = _complex_matmul(pr, pi, wa, wb, b2, tm=tm,
                           vmem_limit_bytes=vmem_limit)

    out_r = out2[:M, :C_out].reshape(N, OH, OW, C_out)
    out_i = out2[:M, C_out:two_cout].reshape(N, OH, OW, C_out)
    # TODO(synk): returning NHWC (or fusing this transpose into the consumer)
    # would save one output-sized copy; NCHW kept to match the PyTorch module.
    return (jnp.transpose(out_r, (0, 3, 1, 2)),
            jnp.transpose(out_i, (0, 3, 1, 2)))


class ComplexConv2d:
    """Deterministically-initialized complex Conv2d using the Pallas kernel."""

    def __init__(self, in_channels, out_channels, kernel_size=3, stride=1,
                 padding=0, dilation=1, groups=1, bias=True, key=None):
        assert groups == 1, "groups != 1 not implemented"
        self.in_channels = in_channels
        self.out_channels = out_channels
        self.kh = self.kw = kernel_size
        self.stride = stride
        self.padding = padding
        self.dilation = dilation
        self.use_bias = bias

        if key is None:
            key = jax.random.PRNGKey(42)
        k1, k2, k3, k4 = jax.random.split(key, 4)
        fan_in = in_channels * self.kh * self.kw
        bound = 1.0 / (fan_in ** 0.5)
        wshape = (out_channels, in_channels, self.kh, self.kw)
        self.w_r = jax.random.uniform(k1, wshape, jnp.float32, -bound, bound)
        self.w_i = jax.random.uniform(k2, wshape, jnp.float32, -bound, bound)
        if bias:
            self.b_r = jax.random.uniform(k3, (out_channels,), jnp.float32,
                                          -bound, bound)
            self.b_i = jax.random.uniform(k4, (out_channels,), jnp.float32,
                                          -bound, bound)
        else:
            self.b_r = jnp.zeros((out_channels,), jnp.float32)
            self.b_i = jnp.zeros((out_channels,), jnp.float32)

    def __call__(self, x_r, x_i):
        return _complex_conv2d_fwd(
            x_r, x_i, self.w_r, self.w_i, self.b_r, self.b_i,
            kh=self.kh, kw=self.kw, stride=self.stride,
            padding=self.padding, dilation=self.dilation)


# -----------------------------------------------------------------------------
# Reference (plain JAX/XLA) for correctness checking
# -----------------------------------------------------------------------------
def _ref_conv(x, w, b, stride, padding, dilation):
    out = jax.lax.conv_general_dilated(
        x, w, window_strides=(stride, stride),
        padding=[(padding, padding), (padding, padding)],
        rhs_dilation=(dilation, dilation),
        dimension_numbers=("NCHW", "OIHW", "NCHW"))
    return out + b.reshape(1, -1, 1, 1)


def _ref_complex_conv(mod, x_r, x_i):
    cr_r = _ref_conv(x_r, mod.w_r, mod.b_r, mod.stride, mod.padding, mod.dilation)
    cr_i = _ref_conv(x_i, mod.w_r, mod.b_r, mod.stride, mod.padding, mod.dilation)
    ci_r = _ref_conv(x_r, mod.w_i, mod.b_i, mod.stride, mod.padding, mod.dilation)
    ci_i = _ref_conv(x_i, mod.w_i, mod.b_i, mod.stride, mod.padding, mod.dilation)
    return cr_r - ci_i, cr_i + ci_r


if __name__ == "__main__":
    key = jax.random.PRNGKey(0)
    kx, ky, kp1, kp2 = jax.random.split(key, 4)

    N, C_in, H, W = 2, 4, 16, 16
    x_r = jax.random.normal(kx, (N, C_in, H, W), jnp.float32)
    x_i = jax.random.normal(ky, (N, C_in, H, W), jnp.float32)

    # bf16 operands (f32 accumulation) -> loosened tolerances vs pure-f32.
    ATOL = RTOL = 3e-2

    # Config 1: vanilla 3x3, no padding, biased.
    mod1 = ComplexConv2d(C_in, 8, kernel_size=3, stride=1, padding=0,
                         dilation=1, groups=1, bias=True, key=kp1)
    o1_r, o1_i = mod1(x_r, x_i)
    o1_r = jax.block_until_ready(o1_r)
    o1_i = jax.block_until_ready(o1_i)
    assert o1_r.shape == (N, 8, H - 2, W - 2), o1_r.shape
    assert o1_i.shape == (N, 8, H - 2, W - 2), o1_i.shape
    r1_r, r1_i = _ref_complex_conv(mod1, x_r, x_i)
    assert jnp.allclose(o1_r, r1_r, atol=ATOL, rtol=RTOL)
    assert jnp.allclose(o1_i, r1_i, atol=ATOL, rtol=RTOL)

    # Config 2: strided, padded, odd C_out, biased.
    mod2 = ComplexConv2d(C_in, 6, kernel_size=3, stride=2, padding=1,
                         dilation=1, groups=1, bias=True, key=kp2)
    o2_r, o2_i = mod2(x_r, x_i)
    o2_r = jax.block_until_ready(o2_r)
    o2_i = jax.block_until_ready(o2_i)
    assert o2_r.shape == (N, 6, 8, 8), o2_r.shape
    assert o2_i.shape == (N, 6, 8, 8), o2_i.shape
    r2_r, r2_i = _ref_complex_conv(mod2, x_r, x_i)
    assert jnp.allclose(o2_r, r2_r, atol=ATOL, rtol=RTOL)
    assert jnp.allclose(o2_i, r2_i, atol=ATOL, rtol=RTOL)

    print("KERNEL_OK")
</pallas_src>

<mosaic_0001>
module attributes {stable_mosaic.version = 11 : i64} {
  func.func @_complex_mm_kernel(%arg0: i32, %arg1: memref<256x40xbf16, #tpu.memory_space<vmem>>, %arg2: memref<256x40xbf16, #tpu.memory_space<vmem>>, %arg3: memref<40x16xbf16, #tpu.memory_space<vmem>>, %arg4: memref<40x16xbf16, #tpu.memory_space<vmem>>, %arg5: memref<1x16xf32, #tpu.memory_space<vmem>>, %arg6: memref<256x16xf32, #tpu.memory_space<vmem>>) attributes {dimension_semantics = [#tpu.dimension_semantics<parallel>], iteration_bounds = array<i64: 2>, scalar_prefetch = 0 : i64, scratch_operands = 0 : i64, tpu.core_type = #tpu.core_type<tc>, window_params = [{transform_indices = @transform_0, window_bounds = array<i64: 256, 40>}, {transform_indices = @transform_1, window_bounds = array<i64: 256, 40>}, {pipeline_mode = #tpu.pipeline_mode<synchronous>, transform_indices = @transform_2, window_bounds = array<i64: 40, 16>}, {pipeline_mode = #tpu.pipeline_mode<synchronous>, transform_indices = @transform_3, window_bounds = array<i64: 40, 16>}, {pipeline_mode = #tpu.pipeline_mode<synchronous>, transform_indices = @transform_4, window_bounds = array<i64: 1, 16>}, {transform_indices = @transform_5, window_bounds = array<i64: 256, 16>}]} {
    %c0 = arith.constant 0 : index
    %c0_0 = arith.constant 0 : index
    %0 = vector.load %arg1[%c0, %c0_0] : memref<256x40xbf16, #tpu.memory_space<vmem>>, vector<256x40xbf16>
    %c0_1 = arith.constant 0 : index
    %c0_2 = arith.constant 0 : index
    %1 = vector.load %arg3[%c0_1, %c0_2] : memref<40x16xbf16, #tpu.memory_space<vmem>>, vector<40x16xbf16>
    %cst = arith.constant dense<0.000000e+00> : vector<256x16xf32>
    %2 = tpu.matmul %0, %1, %cst {dimension_numbers = #tpu.dot_dimension_numbers<[1], [0], [0], [1], [0, 0, 1, 1], [], []>} : vector<256x40xbf16>, vector<40x16xbf16>, vector<256x16xf32> -> vector<256x16xf32>
    %c0_3 = arith.constant 0 : index
    %c0_4 = arith.constant 0 : index
    %3 = vector.load %arg2[%c0_3, %c0_4] : memref<256x40xbf16, #tpu.memory_space<vmem>>, vector<256x40xbf16>
    %c0_5 = arith.constant 0 : index
    %c0_6 = arith.constant 0 : index
    %4 = vector.load %arg4[%c0_5, %c0_6] : memref<40x16xbf16, #tpu.memory_space<vmem>>, vector<40x16xbf16>
    %cst_7 = arith.constant dense<0.000000e+00> : vector<256x16xf32>
    %5 = tpu.matmul %3, %4, %cst_7 {dimension_numbers = #tpu.dot_dimension_numbers<[1], [0], [0], [1], [0, 0, 1, 1], [], []>} : vector<256x40xbf16>, vector<40x16xbf16>, vector<256x16xf32> -> vector<256x16xf32>
    %6 = arith.addf %2, %5 : vector<256x16xf32>
    %c0_8 = arith.constant 0 : index
    %c0_9 = arith.constant 0 : index
    %7 = vector.load %arg5[%c0_8, %c0_9] : memref<1x16xf32, #tpu.memory_space<vmem>>, vector<1x16xf32>
    %8 = vector.broadcast %7 : vector<1x16xf32> to vector<256x16xf32>
    %9 = arith.addf %6, %8 : vector<256x16xf32>
    %c0_10 = arith.constant 0 : index
    %c0_11 = arith.constant 0 : index
    %10 = vector.load %arg6[%c0_10, %c0_11] : memref<256x16xf32, #tpu.memory_space<vmem>>, vector<256x16xf32>
    tpu.vector_store %arg6[%c0_10, %c0_11], %9 {strides = array<i32>} : memref<256x16xf32, #tpu.memory_space<vmem>>, vector<256x16xf32>,
    return
  }
  func.func @transform_0(%arg0: i32) -> (i32, i32) {
    %c0_i32 = arith.constant 0 : i32
    %c0_i32_0 = arith.constant 0 : i32
    return %arg0, %c0_i32 : i32, i32
  }
  func.func @transform_1(%arg0: i32) -> (i32, i32) {
    %c0_i32 = arith.constant 0 : i32
    %c0_i32_0 = arith.constant 0 : i32
    return %arg0, %c0_i32 : i32, i32
  }
  func.func @transform_2(%arg0: i32) -> (i32, i32) {
    %c0_i32 = arith.constant 0 : i32
    %c0_i32_0 = arith.constant 0 : i32
    %c0_i32_1 = arith.constant 0 : i32
    return %c0_i32, %c0_i32_0 : i32, i32
  }
  func.func @transform_3(%arg0: i32) -> (i32, i32) {
    %c0_i32 = arith.constant 0 : i32
    %c0_i32_0 = arith.constant 0 : i32
    %c0_i32_1 = arith.constant 0 : i32
    return %c0_i32, %c0_i32_0 : i32, i32
  }
  func.func @transform_4(%arg0: i32) -> (i32, i32) {
    %c0_i32 = arith.constant 0 : i32
    %c0_i32_0 = arith.constant 0 : i32
    %c0_i32_1 = arith.constant 0 : i32
    return %c0_i32, %c0_i32_0 : i32, i32
  }
  func.func @transform_5(%arg0: i32) -> (i32, i32) {
    %c0_i32 = arith.constant 0 : i32
    %c0_i32_0 = arith.constant 0 : i32
    return %arg0, %c0_i32 : i32, i32
  }
}

</mosaic_0001>

<bundles_post_ra>
// kernel: _complex_conv2d_fwd.1
= control target key start
LH: loop header
LB: loop body
LE: loop exit
PB: predicated region body
PF: predicated region fallthrough
CT: control target
= control target key end

     0   :  { %s1365_s18 = smov 0   ;;  %s1578_s0 = inlined_call_operand.vmem [shape: bf16[512,40], index: 0, kind: input, shape index: {}]   ;;  %s1579_s1 = inlined_call_operand.vmem [shape: bf16[512,40], index: 1, kind: input, shape index: {}]   ;;  %s1580_s2 = inlined_call_operand.vmem [shape: bf16[40,16], index: 2, kind: input, shape index: {}]   ;;  %s1581_s3 = inlined_call_operand.vmem [shape: bf16[40,16], index: 3, kind: input, shape index: {}]   ;;  %s1582_s4 = inlined_call_operand.vmem [shape: f32[1,16], index: 4, kind: input, shape index: {}]   ;;  %s1583_s5 = inlined_call_operand.vmem [shape: f32[512,16], index: 5, kind: output, shape index: {}]  }
   0x1 LB: > { %s1081_s19 = sadd.s32 4294967295, %s1333_s18   ;;  %p1085_p0 = scmp.ge.s32.totalorder %s1333_s18, 1  ;;  %s1333_s18 = sphi %s1365_s18, %s15_s18  }
   0x2   : > { %p199_p1 = scmp.lt.s32.totalorder %s1333_s18, 3 }
   0x4   : > { %p200_p2 = pnand %p1085_p0, %p199_p1 }
   0x5   : > { %s1086_s7 = sshll.u32 (!%p200_p2), %s1081_s19, 5 }
   0x6   : > { %203 = sbr.rel (%p200_p2) target bundleno = 285 (0x11d), region = 40  ;;  %p233_p3 = scmp.lt.s32.totalorder (!%p200_p2), %s1086_s7, 63 }
   0xb   : > { %v1289_v0 = vld [vmem:[%s1581_s3 + $0x10] ss:$0 sps:$4 sm:$0xff]   ;;  %vm469_vm0 = vcmask 1043456   ;;  %v1291_v1 = vld [vmem:[%s1581_s3 + $0x8] sm:$0xff]   ;;  %v1293_v6 = vld [vmem:[%s1581_s3] sm:$0xff]   ;;  %s1585_s7 = smov (!%p233_p3, %s1086_s7), 63 }
   0xc   : > { %v1290_v2 = vld [vmem:[%s1580_s2 + $0x10] ss:$0 sps:$4 sm:$0xff]   ;;  %1279 = vmatprep.subr.msk.bf16.mxu0 %vm469_vm0, %v1289_v0  ;;  %v471_v3 = vsel %vm469_vm0, %v1289_v0, 0  ;;  %v1292_v4 = vld [vmem:[%s1580_s2 + $0x8] sm:$0xff]   ;;  %v1294_v7 = vld [vmem:[%s1580_s2] sm:$0xff]   ;;  %s1087_s8 = sshll.u32 %s1585_s7, 2 }
   0xd   : > { %1280 = vmatprep.subr.msk.bf16.mxu1 %vm469_vm0, %v1290_v2  ;;  %1204 = vmatpush3.bf16.msra.mxu0 %v471_v3  ;;  %v778_v5 = vsel %vm469_vm0, %v1290_v2, 0  ;;  %s1397_s11 = scalar_lea.vmem %s1579_s1, %s1087_s8  ;;  %vm420_vm1 = vcmask 326656   ;;  %s1402_s14 = scalar_lea.vmem %s1578_s0, %s1087_s8  ;;  %v1472_v42 = vld [vmem:[%s1582_s4] ss:$0 sm:$0xff]  ;;  %vm980_vm2 = vcmask 130048  }
   0xe   : > { %1242 = vmatpush3.bf16.msra.mxu1 %v778_v5  ;;  %1205 = vmatprep.subr.bf16.mxu0 %v1291_v1  ;;  %v1295_v8 = vld [vmem:[%s1397_s11] sm:$0xff]   ;;  %v1297_v10 = vld [vmem:[%s1397_s11 + $0x8] sm:$0xff]   ;;  %v1299_v12 = vld [vmem:[%s1397_s11 + $0x10] sm:$0xff]   ;;  %s1091_s15 = sshll.u32 %s1585_s7, 3 }
   0xf   : > { %1243 = vmatprep.subr.bf16.mxu1 %v1292_v4  ;;  %v1296_v9 = vld [vmem:[%s1402_s14] sm:$0xff]   ;;  %1209 = vmatprep.mubr.msk.bf16.mxu0 %vm420_vm1, %v1295_v8  ;;  %v1298_v11 = vld [vmem:[%s1402_s14 + $0x8] sm:$0xff]   ;;  %v1300_v13 = vld [vmem:[%s1402_s14 + $0x10] sm:$0xff]   ;;  %s1477_s21 = scalar_lea.vmem %s1583_s5, %s1091_s15 }
  0x10   : > { %1247 = vmatprep.mubr.msk.bf16.mxu1 %vm420_vm1, %v1296_v9  ;;  %v1301_v14 = vld [vmem:[%s1397_s11 + $0x18] sm:$0xff]   ;;  %v1303_v16 = vld [vmem:[%s1397_s11 + $0x20] sm:$0xff]   ;;  %v1305_v18 = vld [vmem:[%s1397_s11 + $0x28] sm:$0xff]  }
  0x11   : > { %1206 = vmatpush3.bf16.msra.mxu0 %v1291_v1  ;;  %v1302_v15 = vld [vmem:[%s1402_s14 + $0x18] sm:$0xff]   ;;  %v1304_v17 = vld [vmem:[%s1402_s14 + $0x20] sm:$0xff]   ;;  %v1306_v19 = vld [vmem:[%s1402_s14 + $0x28] sm:$0xff]  }
  0x12   : > { %1244 = vmatpush3.bf16.msra.mxu1 %v1292_v4  ;;  %1207 = vmatprep.subr.bf16.mxu0 %v1293_v6  ;;  %v1307_v20 = vld [vmem:[%s1397_s11 + $0x30] sm:$0xff]   ;;  %v1309_v22 = vld [vmem:[%s1397_s11 + $0x38] sm:$0xff]   ;;  %v1311_v24 = vld [vmem:[%s1397_s11 + $0x40] sm:$0xff]  }
  0x13   : > { %1245 = vmatprep.subr.bf16.mxu1 %v1294_v7  ;;  %v1308_v21 = vld [vmem:[%s1402_s14 + $0x30] sm:$0xff]   ;;  %v1310_v23 = vld [vmem:[%s1402_s14 + $0x38] sm:$0xff]   ;;  %v1312_v25 = vld [vmem:[%s1402_s14 + $0x40] sm:$0xff]  }
  0x14   : > { %v1313_v26 = vld [vmem:[%s1397_s11 + $0x48] sm:$0xff]   ;;  %v1315_v28 = vld [vmem:[%s1397_s11 + $0x50] sm:$0xff]   ;;  %v1317_v30 = vld [vmem:[%s1397_s11 + $0x58] sm:$0xff]  }
  0x15   : > { %1208 = vmatpush3.bf16.msra.mxu0 %v1293_v6  ;;  %v1314_v27 = vld [vmem:[%s1402_s14 + $0x48] sm:$0xff]   ;;  %v1316_v29 = vld [vmem:[%s1402_s14 + $0x50] sm:$0xff]   ;;  %v1318_v31 = vld [vmem:[%s1402_s14 + $0x58] sm:$0xff]  }
  0x16   : > { %1246 = vmatpush3.bf16.msra.mxu1 %v1294_v7  ;;  %v1319_v32 = vld [vmem:[%s1397_s11 + $0x60] sm:$0xff]   ;;  %v1321_v34 = vld [vmem:[%s1397_s11 + $0x68] sm:$0xff]   ;;  %v1323_v36 = vld [vmem:[%s1397_s11 + $0x70] sm:$0xff]  }
  0x17   : > { %v1320_v33 = vld [vmem:[%s1402_s14 + $0x60] sm:$0xff]   ;;  %v1322_v35 = vld [vmem:[%s1402_s14 + $0x68] sm:$0xff]   ;;  %v1324_v37 = vld [vmem:[%s1402_s14 + $0x70] sm:$0xff]  }
  0x18   : > { %1210 = vmatmul.mubr.msk.bf16.vlgmr.msra.gmra.mxu0 %vm420_vm1, %v1297_v10  ;;  %v1325_v38 = vld [vmem:[%s1397_s11 + $0x78] sm:$0xff]  }
  0x19   : > { %1248 = vmatmul.mubr.msk.bf16.vlgmr.msra.gmra.mxu1 %vm420_vm1, %v1298_v11  ;;  %1213 = vmatprep.mubr.msk.bf16.mxu0 %vm420_vm1, %v1299_v12  ;;  %v1326_v39 = vld [vmem:[%s1402_s14 + $0x78] sm:$0xff]  }
  0x1a   : > { %1251 = vmatprep.mubr.msk.bf16.mxu1 %vm420_vm1, %v1300_v13 }
  0x20   : > { %1214 = vmatmul.mubr.msk.bf16.gmra.mxu0 %vm420_vm1, %v1301_v14 }
  0x21   : > { %1252 = vmatmul.mubr.msk.bf16.gmra.mxu1 %vm420_vm1, %v1302_v15  ;;  %1217 = vmatprep.mubr.msk.bf16.mxu0 %vm420_vm1, %v1303_v16 }
  0x22   : > { %1255 = vmatprep.mubr.msk.bf16.mxu1 %vm420_vm1, %v1304_v17 }
  0x28   : > { %1218 = vmatmul.mubr.msk.bf16.gmra.mxu0 %vm420_vm1, %v1305_v18 }
  0x29   : > { %1256 = vmatmul.mubr.msk.bf16.gmra.mxu1 %vm420_vm1, %v1306_v19  ;;  %1221 = vmatprep.mubr.msk.bf16.mxu0 %vm420_vm1, %v1307_v20 }
  0x2a   : > { %1259 = vmatprep.mubr.msk.bf16.mxu1 %vm420_vm1, %v1308_v21 }
  0x30   : > { %1222 = vmatmul.mubr.msk.bf16.gmra.mxu0 %vm420_vm1, %v1309_v22 }
  0x31   : > { %1260 = vmatmul.mubr.msk.bf16.gmra.mxu1 %vm420_vm1, %v1310_v23  ;;  %1225 = vmatprep.mubr.msk.bf16.mxu0 %vm420_vm1, %v1311_v24 }
  0x32   : > { %1263 = vmatprep.mubr.msk.bf16.mxu1 %vm420_vm1, %v1312_v25 }
  0x38   : > { %1226 = vmatmul.mubr.msk.bf16.gmra.mxu0 %vm420_vm1, %v1313_v26 }
  0x39   : > { %1264 = vmatmul.mubr.msk.bf16.gmra.mxu1 %vm420_vm1, %v1314_v27  ;;  %1229 = vmatprep.mubr.msk.bf16.mxu0 %vm420_vm1, %v1315_v28 }
  0x3a   : > { %1267 = vmatprep.mubr.msk.bf16.mxu1 %vm420_vm1, %v1316_v29 }
  0x40   : > { %1230 = vmatmul.mubr.msk.bf16.gmra.mxu0 %vm420_vm1, %v1317_v30 }
  0x41   : > { %1268 = vmatmul.mubr.msk.bf16.gmra.mxu1 %vm420_vm1, %v1318_v31  ;;  %1233 = vmatprep.mubr.msk.bf16.mxu0 %vm420_vm1, %v1319_v32 }
  0x42   : > { %1271 = vmatprep.mubr.msk.bf16.mxu1 %vm420_vm1, %v1320_v33 }
  0x48   : > { %1234 = vmatmul.mubr.msk.bf16.gmra.mxu0 %vm420_vm1, %v1321_v34 }
  0x49   : > { %1272 = vmatmul.mubr.msk.bf16.gmra.mxu1 %vm420_vm1, %v1322_v35  ;;  %1237 = vmatprep.mubr.msk.bf16.mxu0 %vm420_vm1, %v1323_v36 }
  0x4a   : > { %1275 = vmatprep.mubr.msk.bf16.mxu1 %vm420_vm1, %v1324_v37 }
  0x50   : > { %1238 = vmatmul.mubr.msk.bf16.gmra.mxu0 %vm420_vm1, %v1325_v38 }
  0x51   : > { %1276 = vmatmul.mubr.msk.bf16.gmra.mxu1 %vm420_vm1, %v1326_v39 }
  0xd8   : > { %v1211_v40 = vpop.f32.mrf.mxu0 }
  0xd9   : > { %v1249_v41 = vpop.f32.mrf.mxu1 }
  0xda   : > { %v823_v43 = vadd.f32 %v1249_v41, %v1211_v40  ;;  %v507_v44 = vpop.f32.mrf.mxu0 }
  0xdb   : > { %v814_v45 = vpop.f32.mrf.mxu1 }
  0xdc   : > { %v950_v46 = vadd.f32 %v1472_v42, %v823_v43  ;;  %v815_v47 = vadd.f32 %v814_v45, %v507_v44  ;;  %v1212_v48 = vpop.f32.mrf.mxu0 }
  0xdd   : > { %v1250_v49 = vpop.f32.mrf.mxu1 }
  0xde   : > { %983 = vst.msk [vmem:[%s1477_s21 + $0x10] sm:$0xff] %vm980_vm2, %v950_v46  ;;  %v948_v50 = vadd.f32 %v1472_v42, %v815_v47  ;;  %v826_v51 = vadd.f32 %v1250_v49, %v1212_v48  ;;  %v510_v52 = vpop.f32.mrf.mxu0 }
  0xdf   : > { %v817_v53 = vpop.f32.mrf.mxu1 }
  0xe0   : > { %981 = vst.msk [vmem:[%s1477_s21] sm:$0xff] %vm980_vm2, %v948_v50  ;;  %v951_v54 = vadd.f32 %v1472_v42, %v826_v51  ;;  %v818_v55 = vadd.f32 %v817_v53, %v510_v52  ;;  %v1215_v56 = vpop.f32.mrf.mxu0 }
  0xe1   : > { %v1253_v57 = vpop.f32.mrf.mxu1 }
  0xe2   : > { %984 = vst.msk [vmem:[%s1477_s21 + $0x18] sm:$0xff] %vm980_vm2, %v951_v54  ;;  %v949_v58 = vadd.f32 %v1472_v42, %v818_v55  ;;  %v839_v59 = vadd.f32 %v1253_v57, %v1215_v56  ;;  %v523_v60 = vpop.f32.mrf.mxu0 }
  0xe3   : > { %v830_v61 = vpop.f32.mrf.mxu1 }
  0xe4   : > { %982 = vst.msk [vmem:[%s1477_s21 + $0x8] sm:$0xff] %vm980_vm2, %v949_v58  ;;  %v954_v62 = vadd.f32 %v1472_v42, %v839_v59  ;;  %v831_v63 = vadd.f32 %v830_v61, %v523_v60  ;;  %v1216_v0 = vpop.f32.mrf.mxu0 }
  0xe5   : > { %v1254_v1 = vpop.f32.mrf.mxu1 }
  0xe6   : > { %987 = vst.msk [vmem:[%s1477_s21 + $0x30] sm:$0xff] %vm980_vm2, %v954_v62  ;;  %v952_v2 = vadd.f32 %v1472_v42, %v831_v63  ;;  %v842_v3 = vadd.f32 %v1254_v1, %v1216_v0  ;;  %v526_v4 = vpop.f32.mrf.mxu0 }
  0xe7   : > { %v833_v5 = vpop.f32.mrf.mxu1 }
  0xe8   : > { %985 = vst.msk [vmem:[%s1477_s21 + $0x20] sm:$0xff] %vm980_vm2, %v952_v2  ;;  %v955_v6 = vadd.f32 %v1472_v42, %v842_v3  ;;  %v834_v7 = vadd.f32 %v833_v5, %v526_v4  ;;  %v1219_v8 = vpop.f32.mrf.mxu0 }
  0xe9   : > { %v1257_v9 = vpop.f32.mrf.mxu1 }
  0xea   : > { %988 = vst.msk [vmem:[%s1477_s21 + $0x38] sm:$0xff] %vm980_vm2, %v955_v6  ;;  %v953_v10 = vadd.f32 %v1472_v42, %v834_v7  ;;  %v855_v11 = vadd.f32 %v1257_v9, %v1219_v8  ;;  %v539_v12 = vpop.f32.mrf.mxu0 }
  0xeb   : > { %v846_v13 = vpop.f32.mrf.mxu1 }
  0xec   : > { %986 = vst.msk [vmem:[%s1477_s21 + $0x28] sm:$0xff] %vm980_vm2, %v953_v10  ;;  %v958_v14 = vadd.f32 %v1472_v42, %v855_v11  ;;  %v847_v15 = vadd.f32 %v846_v13, %v539_v12  ;;  %v1220_v16 = vpop.f32.mrf.mxu0 }
  0xed   : > { %v1258_v17 = vpop.f32.mrf.mxu1 }
  0xee   : > { %991 = vst.msk [vmem:[%s1477_s21 + $0x50] sm:$0xff] %vm980_vm2, %v958_v14  ;;  %v956_v18 = vadd.f32 %v1472_v42, %v847_v15  ;;  %v858_v19 = vadd.f32 %v1258_v17, %v1220_v16  ;;  %v542_v20 = vpop.f32.mrf.mxu0 }
  0xef   : > { %v849_v21 = vpop.f32.mrf.mxu1 }
  0xf0   : > { %989 = vst.msk [vmem:[%s1477_s21 + $0x40] sm:$0xff] %vm980_vm2, %v956_v18  ;;  %v959_v22 = vadd.f32 %v1472_v42, %v858_v19  ;;  %v850_v23 = vadd.f32 %v849_v21, %v542_v20  ;;  %v1223_v24 = vpop.f32.mrf.mxu0 }
  0xf1   : > { %v1261_v25 = vpop.f32.mrf.mxu1 }
  0xf2   : > { %992 = vst.msk [vmem:[%s1477_s21 + $0x58] sm:$0xff] %vm980_vm2, %v959_v22  ;;  %v957_v26 = vadd.f32 %v1472_v42, %v850_v23  ;;  %v871_v27 = vadd.f32 %v1261_v25, %v1223_v24  ;;  %v555_v28 = vpop.f32.mrf.mxu0 }
  0xf3   : > { %v862_v29 = vpop.f32.mrf.mxu1 }
  0xf4   : > { %990 = vst.msk [vmem:[%s1477_s21 + $0x48] sm:$0xff] %vm980_vm2, %v957_v26  ;;  %v962_v30 = vadd.f32 %v1472_v42, %v871_v27  ;;  %v863_v31 = vadd.f32 %v862_v29, %v555_v28  ;;  %v1224_v32 = vpop.f32.mrf.mxu0 }
  0xf5   : > { %v1262_v33 = vpop.f32.mrf.mxu1 }
  0xf6   : > { %995 = vst.msk [vmem:[%s1477_s21 + $0x70] sm:$0xff] %vm980_vm2, %v962_v30  ;;  %v960_v34 = vadd.f32 %v1472_v42, %v863_v31  ;;  %v874_v35 = vadd.f32 %v1262_v33, %v1224_v32  ;;  %v558_v36 = vpop.f32.mrf.mxu0 }
  0xf7   : > { %v865_v37 = vpop.f32.mrf.mxu1 }
  0xf8   : > { %993 = vst.msk [vmem:[%s1477_s21 + $0x60] sm:$0xff] %vm980_vm2, %v960_v34  ;;  %v963_v38 = vadd.f32 %v1472_v42, %v874_v35  ;;  %v866_v39 = vadd.f32 %v865_v37, %v558_v36  ;;  %v1227_v40 = vpop.f32.mrf.mxu0 }
  0xf9   : > { %v1265_v41 = vpop.f32.mrf.mxu1 }
  0xfa   : > { %996 = vst.msk [vmem:[%s1477_s21 + $0x78] sm:$0xff] %vm980_vm2, %v963_v38  ;;  %v961_v43 = vadd.f32 %v1472_v42, %v866_v39  ;;  %v887_v44 = vadd.f32 %v1265_v41, %v1227_v40  ;;  %v571_v45 = vpop.f32.mrf.mxu0 }
  0xfb   : > { %v878_v46 = vpop.f32.mrf.mxu1 }
  0xfc   : > { %994 = vst.msk [vmem:[%s1477_s21 + $0x68] sm:$0xff] %vm980_vm2, %v961_v43  ;;  %v966_v47 = vadd.f32 %v1472_v42, %v887_v44  ;;  %v879_v48 = vadd.f32 %v878_v46, %v571_v45  ;;  %v1228_v49 = vpop.f32.mrf.mxu0 }
  0xfd   : > { %v1266_v50 = vpop.f32.mrf.mxu1 }
  0xfe   : > { %999 = vst.msk [vmem:[%s1477_s21 + $0x90] sm:$0xff] %vm980_vm2, %v966_v47  ;;  %v964_v51 = vadd.f32 %v1472_v42, %v879_v48  ;;  %v890_v52 = vadd.f32 %v1266_v50, %v1228_v49  ;;  %v574_v53 = vpop.f32.mrf.mxu0 }
  0xff   : > { %v881_v54 = vpop.f32.mrf.mxu1 }
 0x100   : > { %997 = vst.msk [vmem:[%s1477_s21 + $0x80] sm:$0xff] %vm980_vm2, %v964_v51  ;;  %v967_v55 = vadd.f32 %v1472_v42, %v890_v52  ;;  %v882_v56 = vadd.f32 %v881_v54, %v574_v53  ;;  %v1231_v57 = vpop.f32.mrf.mxu0 }
 0x101   : > { %v1269_v58 = vpop.f32.mrf.mxu1 }
 0x102   : > { %1000 = vst.msk [vmem:[%s1477_s21 + $0x98] sm:$0xff] %vm980_vm2, %v967_v55  ;;  %v965_v59 = vadd.f32 %v1472_v42, %v882_v56  ;;  %v903_v60 = vadd.f32 %v1269_v58, %v1231_v57  ;;  %v587_v61 = vpop.f32.mrf.mxu0 }
 0x103   : > { %v894_v62 = vpop.f32.mrf.mxu1 }
 0x104   : > { %998 = vst.msk [vmem:[%s1477_s21 + $0x88] sm:$0xff] %vm980_vm2, %v965_v59  ;;  %v970_v63 = vadd.f32 %v1472_v42, %v903_v60  ;;  %v895_v0 = vadd.f32 %v894_v62, %v587_v61  ;;  %v1232_v1 = vpop.f32.mrf.mxu0 }
 0x105   : > { %v1270_v2 = vpop.f32.mrf.mxu1 }
 0x106   : > { %1003 = vst.msk [vmem:[%s1477_s21 + $0xb0] sm:$0xff] %vm980_vm2, %v970_v63  ;;  %v968_v3 = vadd.f32 %v1472_v42, %v895_v0  ;;  %v906_v4 = vadd.f32 %v1270_v2, %v1232_v1  ;;  %v590_v5 = vpop.f32.mrf.mxu0 }
 0x107   : > { %v897_v6 = vpop.f32.mrf.mxu1 }
 0x108   : > { %1001 = vst.msk [vmem:[%s1477_s21 + $0xa0] sm:$0xff] %vm980_vm2, %v968_v3  ;;  %v971_v7 = vadd.f32 %v1472_v42, %v906_v4  ;;  %v898_v8 = vadd.f32 %v897_v6, %v590_v5  ;;  %v1235_v9 = vpop.f32.mrf.mxu0 }
 0x109   : > { %v1273_v10 = vpop.f32.mrf.mxu1 }
 0x10a   : > { %1004 = vst.msk [vmem:[%s1477_s21 + $0xb8] sm:$0xff] %vm980_vm2, %v971_v7  ;;  %v969_v11 = vadd.f32 %v1472_v42, %v898_v8  ;;  %v919_v12 = vadd.f32 %v1273_v10, %v1235_v9  ;;  %v603_v13 = vpop.f32.mrf.mxu0 }
 0x10b   : > { %v910_v14 = vpop.f32.mrf.mxu1 }
 0x10c   : > { %1002 = vst.msk [vmem:[%s1477_s21 + $0xa8] sm:$0xff] %vm980_vm2, %v969_v11  ;;  %v974_v15 = vadd.f32 %v1472_v42, %v919_v12  ;;  %v911_v16 = vadd.f32 %v910_v14, %v603_v13  ;;  %v1236_v17 = vpop.f32.mrf.mxu0 }
 0x10d   : > { %v1274_v18 = vpop.f32.mrf.mxu1 }
 0x10e   : > { %1007 = vst.msk [vmem:[%s1477_s21 + $0xd0] sm:$0xff] %vm980_vm2, %v974_v15  ;;  %v972_v19 = vadd.f32 %v1472_v42, %v911_v16  ;;  %v922_v20 = vadd.f32 %v1274_v18, %v1236_v17  ;;  %v606_v21 = vpop.f32.mrf.mxu0 }
 0x10f   : > { %v913_v22 = vpop.f32.mrf.mxu1 }
 0x110   : > { %1005 = vst.msk [vmem:[%s1477_s21 + $0xc0] sm:$0xff] %vm980_vm2, %v972_v19  ;;  %v975_v23 = vadd.f32 %v1472_v42, %v922_v20  ;;  %v914_v24 = vadd.f32 %v913_v22, %v606_v21  ;;  %v1239_v25 = vpop.f32.mrf.mxu0 }
 0x111   : > { %v1277_v26 = vpop.f32.mrf.mxu1 }
 0x112   : > { %1008 = vst.msk [vmem:[%s1477_s21 + $0xd8] sm:$0xff] %vm980_vm2, %v975_v23  ;;  %v973_v27 = vadd.f32 %v1472_v42, %v914_v24  ;;  %v935_v28 = vadd.f32 %v1277_v26, %v1239_v25  ;;  %v619_v29 = vpop.f32.mrf.mxu0 }
 0x113   : > { %v926_v30 = vpop.f32.mrf.mxu1 }
 0x114   : > { %1006 = vst.msk [vmem:[%s1477_s21 + $0xc8] sm:$0xff] %vm980_vm2, %v973_v27  ;;  %v978_v31 = vadd.f32 %v1472_v42, %v935_v28  ;;  %v927_v32 = vadd.f32 %v926_v30, %v619_v29  ;;  %v1240_v33 = vpop.f32.mrf.mxu0 }
 0x115   : > { %v1278_v34 = vpop.f32.mrf.mxu1 }
 0x116   : > { %1011 = vst.msk [vmem:[%s1477_s21 + $0xf0] sm:$0xff] %vm980_vm2, %v978_v31  ;;  %v976_v35 = vadd.f32 %v1472_v42, %v927_v32  ;;  %v938_v36 = vadd.f32 %v1278_v34, %v1240_v33  ;;  %v622_v37 = vpop.f32.mrf.mxu0 }
 0x117   : > { %v929_v38 = vpop.f32.mrf.mxu1 }
 0x118   : > { %1009 = vst.msk [vmem:[%s1477_s21 + $0xe0] sm:$0xff] %vm980_vm2, %v976_v35  ;;  %v979_v39 = vadd.f32 %v1472_v42, %v938_v36  ;;  %v930_v40 = vadd.f32 %v929_v38, %v622_v37 }
 0x11a   : > { %1012 = vst.msk [vmem:[%s1477_s21 + $0xf8] sm:$0xff] %vm980_vm2, %v979_v39  ;;  %v977_v41 = vadd.f32 %v1472_v42, %v930_v40 }
 0x11c   : > { %1010 = vst.msk [vmem:[%s1477_s21 + $0xe8] sm:$0xff] %vm980_vm2, %v977_v41 }
 0x11d PF: > { %s15_s18 = sadd.s32 1, %s1333_s18  }
 0x11e   : > { %p12_p4 = scmp.ge.s32.totalorder %s15_s18, 4  }
 0x120   :  { %14 = sbr.rel (!%p12_p4) target bundleno = 1 (0x1), region = 73 }

</bundles_post_ra>
